<compile_context>
chip_gen: v5e
topology: v5e:2x2
jax: 0.10.0
libtpu: 0.0.40
codegen_flags: <defaults>
</compile_context>

<pallas_src>
import jax
import jax.numpy as jnp
from jax.experimental import pallas as pl
from jax.experimental.pallas import tpu as pltpu


def haptic_decoder_kernel(x_ref, w1_ref, b1_ref, w2_ref, b2_ref, w3_ref, b3_ref,
                          out_ref):
    # x: (M, D_in) f32   w1: (D_in, H) bf16   w2: (H, H) bf16   w3: (H, D_out) bf16
    # b*: (1, N) f32.  MXU inputs are bf16, accumulation is f32.
    x = x_ref[...]

    h1 = jnp.dot(x.astype(jnp.bfloat16), w1_ref[...],
                 preferred_element_type=jnp.float32) + b1_ref[...]
    h1 = jnp.maximum(h1, 0.0)

    h2 = jnp.dot(h1.astype(jnp.bfloat16), w2_ref[...],
                 preferred_element_type=jnp.float32) + b2_ref[...]
    h2 = jnp.maximum(h2, 0.0)

    out = jnp.dot(h2.astype(jnp.bfloat16), w3_ref[...],
                  preferred_element_type=jnp.float32) + b3_ref[...]
    out_ref[...] = out.astype(out_ref.dtype)


def _cost_estimate(B, d_in, h_dim, d_out):
    flops = 2 * B * (d_in * h_dim + h_dim * h_dim + h_dim * d_out)
    w_bytes = 2 * (d_in * h_dim + h_dim * h_dim + h_dim * d_out)   # bf16 weights
    b_bytes = 4 * (h_dim + h_dim + d_out)                          # f32 biases
    io_bytes = 4 * B * (d_in + d_out)                              # f32 x / out
    return pl.CostEstimate(flops=flops, transcendentals=0,
                           bytes_accessed=w_bytes + b_bytes + io_bytes)


def haptic_renderer_decoder(h, params, *, tile_m=128):
    """h: (B, lstm_dim, z_height, z_width) float32. Returns (B, input_dim) float32."""
    w1, b1, w2, b2, w3, b3 = params
    B = h.shape[0]
    x = h.reshape(B, -1).astype(jnp.float32)   # same flattening as torch .view(batch, -1)

    d_in, h_dim = w1.shape
    d_out = w3.shape[1]
    assert x.shape[1] == d_in

    cost = _cost_estimate(B, d_in, h_dim, d_out)
    out_shape = jax.ShapeDtypeStruct((B, d_out), jnp.float32)

    if B % tile_m == 0 and B // tile_m >= 2:
        # Large batch: tile M only.  Weights/biases are grid-invariant and stay
        # VMEM-resident; x / out tiles double-buffer; parallel axis engages both
        # TensorCores on v7x (megacore on v6e).
        grid = (B // tile_m,)
        out = pl.pallas_call(
            haptic_decoder_kernel,
            out_shape=out_shape,
            grid=grid,
            in_specs=[
                pl.BlockSpec((tile_m, d_in), lambda i: (i, 0)),
                pl.BlockSpec((d_in, h_dim), lambda i: (0, 0)),
                pl.BlockSpec((1, h_dim), lambda i: (0, 0)),
                pl.BlockSpec((h_dim, h_dim), lambda i: (0, 0)),
                pl.BlockSpec((1, h_dim), lambda i: (0, 0)),
                pl.BlockSpec((h_dim, d_out), lambda i: (0, 0)),
                pl.BlockSpec((1, d_out), lambda i: (0, 0)),
            ],
            out_specs=pl.BlockSpec((tile_m, d_out), lambda i: (i, 0)),
            compiler_params=pltpu.CompilerParams(
                dimension_semantics=("parallel",)),
            cost_estimate=cost,
        )(x, w1, b1, w2, b2, w3, b3)
    else:
        # Small batch: single gridless invocation, everything in VMEM.
        vmem = pl.BlockSpec(memory_space=pltpu.MemorySpace.VMEM)
        out = pl.pallas_call(
            haptic_decoder_kernel,
            out_shape=out_shape,
            in_specs=[vmem] * 7,
            out_specs=vmem,
            cost_estimate=cost,
        )(x, w1, b1, w2, b2, w3, b3)
    return out


def init_params(key, in_features, h_dim, out_features):
    """nn.Linear-style init; weights stored transposed (in, out) and cast to bf16."""
    ks = jax.random.split(key, 6)

    def lin(kw, kb, fan_in, fan_out):
        bound = 1.0 / jnp.sqrt(fan_in)
        w = jax.random.uniform(kw, (fan_in, fan_out), jnp.float32, -bound, bound)
        b = jax.random.uniform(kb, (1, fan_out), jnp.float32, -bound, bound)
        return w.astype(jnp.bfloat16), b

    w1, b1 = lin(ks[0], ks[1], in_features, h_dim)
    w2, b2 = lin(ks[2], ks[3], h_dim, h_dim)
    w3, b3 = lin(ks[4], ks[5], h_dim, out_features)
    return (w1, b1, w2, b2, w3, b3)


def reference(x, params):
    """Plain-JAX reference with the same bf16-weight / f32-accumulate math."""
    w1, b1, w2, b2, w3, b3 = params
    h1 = jnp.maximum(jnp.dot(x.astype(jnp.bfloat16), w1,
                             preferred_element_type=jnp.float32) + b1, 0.0)
    h2 = jnp.maximum(jnp.dot(h1.astype(jnp.bfloat16), w2,
                             preferred_element_type=jnp.float32) + b2, 0.0)
    return jnp.dot(h2.astype(jnp.bfloat16), w3,
                   preferred_element_type=jnp.float32) + b3


if __name__ == "__main__":
    # Small shapes consistent with the module structure:
    #   lstm_dim=8, z_height=8, z_width=8 -> flattened input dim 512
    #   h_dim=256, input_dim (fc3 output) = 128
    lstm_dim, z_h, z_w = 8, 8, 8
    h_dim = 256
    input_dim = 128
    d_in = lstm_dim * z_h * z_w

    key = jax.random.PRNGKey(0)
    k_in, k_big, k_p = jax.random.split(key, 3)
    params = init_params(k_p, d_in, h_dim, input_dim)

    # --- Path 1: small batch (gridless, full-VMEM blocks) ---
    batch = 2
    h_small = jax.random.normal(k_in, (batch, lstm_dim, z_h, z_w), dtype=jnp.float32)
    out_small = jax.block_until_ready(haptic_renderer_decoder(h_small, params))
    ref_small = reference(h_small.reshape(batch, -1), params)
    assert out_small.shape == (batch, input_dim)
    assert jnp.allclose(out_small, ref_small, atol=2e-2, rtol=2e-2)

    # --- Path 2: larger batch (M-tiled, parallel grid, VMEM-resident weights) ---
    big_batch = 256
    h_big = jax.random.normal(k_big, (big_batch, lstm_dim, z_h, z_w), dtype=jnp.float32)
    out_big = jax.block_until_ready(haptic_renderer_decoder(h_big, params))
    ref_big = reference(h_big.reshape(big_batch, -1), params)
    assert out_big.shape == (big_batch, input_dim)
    assert jnp.allclose(out_big, ref_big, atol=2e-2, rtol=2e-2)

    print("KERNEL_OK")
</pallas_src>

<mosaic_0001>
module attributes {stable_mosaic.version = 11 : i64} {
  func.func @haptic_decoder_kernel(%arg0: memref<2x512xf32, #tpu.memory_space<vmem>>, %arg1: memref<512x256xbf16, #tpu.memory_space<vmem>>, %arg2: memref<1x256xf32, #tpu.memory_space<vmem>>, %arg3: memref<256x256xbf16, #tpu.memory_space<vmem>>, %arg4: memref<1x256xf32, #tpu.memory_space<vmem>>, %arg5: memref<256x128xbf16, #tpu.memory_space<vmem>>, %arg6: memref<1x128xf32, #tpu.memory_space<vmem>>, %arg7: memref<2x128xf32, #tpu.memory_space<vmem>>) attributes {dimension_semantics = [], scalar_prefetch = 0 : i64, scratch_operands = 0 : i64, tpu.core_type = #tpu.core_type<tc>} {
    %c0 = arith.constant 0 : index
    %c0_0 = arith.constant 0 : index
    %0 = vector.load %arg0[%c0, %c0_0] : memref<2x512xf32, #tpu.memory_space<vmem>>, vector<2x512xf32>
    %1 = arith.truncf %0 : vector<2x512xf32> to vector<2x512xbf16>
    %c0_1 = arith.constant 0 : index
    %c0_2 = arith.constant 0 : index
    %2 = vector.load %arg1[%c0_1, %c0_2] : memref<512x256xbf16, #tpu.memory_space<vmem>>, vector<512x256xbf16>
    %cst = arith.constant dense<0.000000e+00> : vector<2x256xf32>
    %3 = tpu.matmul %1, %2, %cst {dimension_numbers = #tpu.dot_dimension_numbers<[1], [0], [0], [1], [0, 0, 1, 1], [], []>} : vector<2x512xbf16>, vector<512x256xbf16>, vector<2x256xf32> -> vector<2x256xf32>
    %c0_3 = arith.constant 0 : index
    %c0_4 = arith.constant 0 : index
    %4 = vector.load %arg2[%c0_3, %c0_4] : memref<1x256xf32, #tpu.memory_space<vmem>>, vector<1x256xf32>
    %5 = vector.broadcast %4 : vector<1x256xf32> to vector<2x256xf32>
    %6 = arith.addf %3, %5 : vector<2x256xf32>
    %cst_5 = arith.constant 0.000000e+00 : f32
    %7 = vector.broadcast %cst_5 : f32 to vector<2x256xf32>
    %8 = arith.maximumf %6, %7 : vector<2x256xf32>
    %9 = arith.truncf %8 : vector<2x256xf32> to vector<2x256xbf16>
    %c0_6 = arith.constant 0 : index
    %c0_7 = arith.constant 0 : index
    %10 = vector.load %arg3[%c0_6, %c0_7] : memref<256x256xbf16, #tpu.memory_space<vmem>>, vector<256x256xbf16>
    %cst_8 = arith.constant dense<0.000000e+00> : vector<2x256xf32>
    %11 = tpu.matmul %9, %10, %cst_8 {dimension_numbers = #tpu.dot_dimension_numbers<[1], [0], [0], [1], [0, 0, 1, 1], [], []>} : vector<2x256xbf16>, vector<256x256xbf16>, vector<2x256xf32> -> vector<2x256xf32>
    %c0_9 = arith.constant 0 : index
    %c0_10 = arith.constant 0 : index
    %12 = vector.load %arg4[%c0_9, %c0_10] : memref<1x256xf32, #tpu.memory_space<vmem>>, vector<1x256xf32>
    %13 = vector.broadcast %12 : vector<1x256xf32> to vector<2x256xf32>
    %14 = arith.addf %11, %13 : vector<2x256xf32>
    %cst_11 = arith.constant 0.000000e+00 : f32
    %15 = vector.broadcast %cst_11 : f32 to vector<2x256xf32>
    %16 = arith.maximumf %14, %15 : vector<2x256xf32>
    %17 = arith.truncf %16 : vector<2x256xf32> to vector<2x256xbf16>
    %c0_12 = arith.constant 0 : index
    %c0_13 = arith.constant 0 : index
    %18 = vector.load %arg5[%c0_12, %c0_13] : memref<256x128xbf16, #tpu.memory_space<vmem>>, vector<256x128xbf16>
    %cst_14 = arith.constant dense<0.000000e+00> : vector<2x128xf32>
    %19 = tpu.matmul %17, %18, %cst_14 {dimension_numbers = #tpu.dot_dimension_numbers<[1], [0], [0], [1], [0, 0, 1, 1], [], []>} : vector<2x256xbf16>, vector<256x128xbf16>, vector<2x128xf32> -> vector<2x128xf32>
    %c0_15 = arith.constant 0 : index
    %c0_16 = arith.constant 0 : index
    %20 = vector.load %arg6[%c0_15, %c0_16] : memref<1x128xf32, #tpu.memory_space<vmem>>, vector<1x128xf32>
    %21 = vector.broadcast %20 : vector<1x128xf32> to vector<2x128xf32>
    %22 = arith.addf %19, %21 : vector<2x128xf32>
    %c0_17 = arith.constant 0 : index
    %c0_18 = arith.constant 0 : index
    %23 = vector.load %arg7[%c0_17, %c0_18] : memref<2x128xf32, #tpu.memory_space<vmem>>, vector<2x128xf32>
    tpu.vector_store %arg7[%c0_17, %c0_18], %22 {strides = array<i32>} : memref<2x128xf32, #tpu.memory_space<vmem>>, vector<2x128xf32>,
    return
  }
}

</mosaic_0001>

<bundles_post_ra>
// kernel: tpu_custom_call.1
= control target key start
LH: loop header
LB: loop body
LE: loop exit
PB: predicated region body
PF: predicated region fallthrough
CT: control target
= control target key end

     0   :  { %12 = vsyncpa [#allocation3], 0  ;;  %s1859_s0 = inlined_call_operand.hbm [shape: f32[2,512], index: 0, kind: input, shape index: {}]   ;;  %s1860_s1 = inlined_call_operand.hbm [shape: bf16[512,256], index: 1, kind: input, shape index: {}]   ;;  %s1861_s2 = inlined_call_operand.hbm [shape: f32[1,256], index: 2, kind: input, shape index: {}]   ;;  %s1862_s3 = inlined_call_operand.hbm [shape: bf16[256,256], index: 3, kind: input, shape index: {}]   ;;  %s1863_s4 = inlined_call_operand.vmem [shape: f32[1,256], index: 4, kind: input, shape index: {}]   ;;  %s1864_s5 = inlined_call_operand.hbm [shape: bf16[256,128], index: 5, kind: input, shape index: {}]   ;;  %s1865_s6 = inlined_call_operand.vmem [shape: f32[1,128], index: 6, kind: input, shape index: {}]   ;;  %s1866_s7 = inlined_call_operand.hbm [shape: f32[2,128], index: 7, kind: output, shape index: {}]  }
   0x1   :  { %13 = vsyncpa [#allocation6], 0 }
   0x2   :  { %14 = vsyncpa [#allocation9], 0  ;;  %s31_s26 = sshll.u32 %s1860_s1, 4  ;;  %s32_s26 = int_to_ptr.hbm [resolvable:$true] %s31_s26 }
   0x3   :  { %15 = vsyncpa [#allocation4], 0  ;;  %s1769_s27 = smov [#allocation5]   ;;  %s55_s8 = sshll.u32 %s1862_s3, 4  ;;  %s56_s8 = int_to_ptr.hbm [resolvable:$true] %s55_s8 }
   0x4   :  { %s33_s28 = sshll.u32 %s1769_s27, 4  ;;  %s1770_s9 = smov 128   ;;  %s34_s28 = int_to_ptr.vmem [resolvable:$true] %s33_s28 }
   0x5   :  { %s1771_s10 = smov 8   ;;  %s1772_s11 = smov [#allocation8]  }
   0x6   :  { %39 = dma.hbm_to_vmem [thread:$0]  %s32_s26, 8192, %s34_s28, [#allocation6], %s1770_s9, %s1770_s9, %s1771_s10  }
   0x7   :  { %s57_s12 = sshll.u32 %s1772_s11, 4  ;;  %s21_s15 = sshll.u32 %s1859_s0, 4  ;;  %s58_s12 = int_to_ptr.vmem [resolvable:$true] %s57_s12  ;;  %s22_s15 = int_to_ptr.hbm [resolvable:$true] %s21_s15 }
   0x8   :  { %63 = dma.hbm_to_vmem [thread:$0]  %s56_s8, 4096, %s58_s12, [#allocation9], %s1770_s9, %s1770_s9, %s1771_s10  }
   0x9   :  { %s45_s17 = sshll.u32 %s1861_s2, 4  ;;  %s1773_s18 = smov [#allocation2]   ;;  %s46_s17 = int_to_ptr.hbm [resolvable:$true] %s45_s17 }
   0xa   :  { %s23_s19 = sshll.u32 %s1773_s18, 4  ;;  %s1774_s3 = smov [#allocation7]   ;;  %s24_s19 = int_to_ptr.vmem [resolvable:$true] %s23_s19 }
   0xb   :  { %26 = dma.hbm_to_vmem [thread:$0]  %s22_s15, 128, %s24_s19, [#allocation3]  }
   0xc   :  { %s47_s20 = sshll.u32 %s1774_s3, 4  ;;  %s70_s23 = sshll.u32 %s1864_s5, 4  ;;  %s48_s20 = int_to_ptr.vmem [resolvable:$true] %s47_s20  ;;  %s71_s23 = int_to_ptr.hbm [resolvable:$true] %s70_s23 }
   0xd   :  { %50 = dma.hbm_to_vmem [thread:$0]  %s46_s17, 32, %s48_s20, [#allocation6]  }
   0xe   :  { %s1775_s0 = smov [#allocation10]   ;;  %s1776_s25 = smov 64  }
   0xf   :  { %s72_s24 = sshll.u32 %s1775_s0, 4  ;;  %s1777_s26 = smov 4   ;;  %s73_s24 = int_to_ptr.vmem [resolvable:$true] %s72_s24 }
  0x10   :  { %78 = dma.hbm_to_vmem [thread:$0]  %s71_s23, 2048, %s73_s24, [#allocation9], %s1776_s25, %s1776_s25, %s1777_s26  }
  0x11   :  { %1761 = dma.done.wait [#allocation3], 128  }
  0x12   :  { %1762 = vsyncadd [#allocation3], 4294967168 }
  0x13   :  { %1763 = dma.done.wait [#allocation6], 8224  }
  0x14   :  { %1764 = vsyncadd [#allocation6], 4294959072 }
  0x15   :  { %1765 = dma.done.wait [#allocation9], 6144  }
  0x16   :  { %1766 = vsyncadd [#allocation9], 4294961152  ;;  %v1104_v0 = vld [vmem:[#allocation5 + $0x70] sm:$0xf]  ;;  %v1509_v1 = vld [vmem:[#allocation5 + $0x74] sm:$0xf0] }
  0x17   :  { %v1168_v2 = vld [vmem:[#allocation5 + $0xf0] sm:$0xf]  ;;  %v1105_v3 = vor.u32 %v1509_v1, %v1104_v0  ;;  %v1525_v4 = vld [vmem:[#allocation5 + $0xf4] sm:$0xf0]  ;;  %v1096_v11 = vld [vmem:[#allocation5 + $0x60] sm:$0xf] }
  0x18   :  { %v1232_v5 = vld [vmem:[#allocation5 + $0x170] sm:$0xf]  ;;  %v1541_v6 = vld [vmem:[#allocation5 + $0x174] sm:$0xf0]  ;;  %v1169_v7 = vor.u32 %v1525_v4, %v1168_v2  ;;  %v1507_v13 = vld [vmem:[#allocation5 + $0x64] sm:$0xf0] }
  0x19   :  { %v1233_v8 = vor.u32 %v1541_v6, %v1232_v5  ;;  %v1296_v9 = vld [vmem:[#allocation5 + $0x1f0] sm:$0xf]  ;;  %v1557_v10 = vld [vmem:[#allocation5 + $0x1f4] sm:$0xf0]  ;;  %506 = vmatpush.bf16.msra.mxu0 %v1105_v3  ;;  %v1160_v14 = vld [vmem:[#allocation5 + $0xe0] sm:$0xf]  ;;  %v1097_v16 = vor.u32 %v1507_v13, %v1096_v11 }
  0x1a   :  { %v1297_v12 = vor.u32 %v1557_v10, %v1296_v9  ;;  %v1523_v15 = vld [vmem:[#allocation5 + $0xe4] sm:$0xf0]  ;;  %519 = vmatpush.bf16.msra.mxu1 %v1169_v7  ;;  %v1224_v18 = vld [vmem:[#allocation5 + $0x160] sm:$0xf]  ;;  %v1088_v23 = vld [vmem:[#allocation5 + $0x50] sm:$0xf] }
  0x1b   :  { %532 = vmatpush.bf16.msra.mxu2 %v1233_v8  ;;  %v1161_v17 = vor.u32 %v1523_v15, %v1160_v14  ;;  %v1539_v19 = vld [vmem:[#allocation5 + $0x164] sm:$0xf0]  ;;  %v1288_v20 = vld [vmem:[#allocation5 + $0x1e0] sm:$0xf]  ;;  %v1505_v24 = vld [vmem:[#allocation5 + $0x54] sm:$0xf0] }
  0x1c   :  { %545 = vmatpush.bf16.msra.mxu3 %v1297_v12  ;;  %v1225_v21 = vor.u32 %v1539_v19, %v1224_v18  ;;  %v1555_v22 = vld [vmem:[#allocation5 + $0x1e4] sm:$0xf0]  ;;  %v1152_v26 = vld [vmem:[#allocation5 + $0xd0] sm:$0xf]  ;;  %v1521_v27 = vld [vmem:[#allocation5 + $0xd4] sm:$0xf0]  ;;  %v1089_v29 = vor.u32 %v1505_v24, %v1088_v23 }
  0x1d   :  { %v1289_v25 = vor.u32 %v1555_v22, %v1288_v20  ;;  %v1216_v28 = vld [vmem:[#allocation5 + $0x150] sm:$0xf]  ;;  %507 = vmatpush.bf16.msra.mxu0 %v1097_v16  ;;  %v1537_v30 = vld [vmem:[#allocation5 + $0x154] sm:$0xf0]  ;;  %v1153_v33 = vor.u32 %v1521_v27, %v1152_v26  ;;  %v1080_v35 = vld [vmem:[#allocation5 + $0x40] sm:$0xf] }
  0x1e   :  { %v1280_v31 = vld [vmem:[#allocation5 + $0x1d0] sm:$0xf]  ;;  %v1553_v32 = vld [vmem:[#allocation5 + $0x1d4] sm:$0xf0]  ;;  %520 = vmatpush.bf16.msra.mxu1 %v1161_v17  ;;  %v1217_v34 = vor.u32 %v1537_v30, %v1216_v28  ;;  %v1503_v36 = vld [vmem:[#allocation5 + $0x44] sm:$0xf0] }
  0x1f   :  { %533 = vmatpush.bf16.msra.mxu2 %v1225_v21  ;;  %v1144_v37 = vld [vmem:[#allocation5 + $0xc0] sm:$0xf]  ;;  %v1281_v38 = vor.u32 %v1553_v32, %v1280_v31  ;;  %v1519_v39 = vld [vmem:[#allocation5 + $0xc4] sm:$0xf0]  ;;  %v1081_v44 = vor.u32 %v1503_v36, %v1080_v35  ;;  %v1072_v47 = vld [vmem:[#allocation5 + $0x30] sm:$0xf] }
  0x20   :  { %546 = vmatpush.bf16.msra.mxu3 %v1289_v25  ;;  %v1208_v40 = vld [vmem:[#allocation5 + $0x140] sm:$0xf]  ;;  %v1535_v41 = vld [vmem:[#allocation5 + $0x144] sm:$0xf0]  ;;  %v1145_v45 = vor.u32 %v1519_v39, %v1144_v37  ;;  %v1501_v48 = vld [vmem:[#allocation5 + $0x34] sm:$0xf0] }
  0x21   :  { %v1272_v42 = vld [vmem:[#allocation5 + $0x1c0] sm:$0xf]  ;;  %v1551_v43 = vld [vmem:[#allocation5 + $0x1c4] sm:$0xf0]  ;;  %508 = vmatpush.bf16.msra.mxu0 %v1089_v29  ;;  %v1209_v46 = vor.u32 %v1535_v41, %v1208_v40  ;;  %v1136_v49 = vld [vmem:[#allocation5 + $0xb0] sm:$0xf]  ;;  %v1073_v56 = vor.u32 %v1501_v48, %v1072_v47 }
  0x22   :  { %521 = vmatpush.bf16.msra.mxu1 %v1153_v33  ;;  %v1273_v50 = vor.u32 %v1551_v43, %v1272_v42  ;;  %v1517_v51 = vld [vmem:[#allocation5 + $0xb4] sm:$0xf0]  ;;  %v1200_v52 = vld [vmem:[#allocation5 + $0x130] sm:$0xf]  ;;  %v1064_v59 = vld [vmem:[#allocation5 + $0x20] sm:$0xf] }
  0x23   :  { %534 = vmatpush.bf16.msra.mxu2 %v1217_v34  ;;  %v1533_v53 = vld [vmem:[#allocation5 + $0x134] sm:$0xf0]  ;;  %v1264_v54 = vld [vmem:[#allocation5 + $0x1b0] sm:$0xf]  ;;  %v1137_v57 = vor.u32 %v1517_v51, %v1136_v49  ;;  %v1499_v60 = vld [vmem:[#allocation5 + $0x24] sm:$0xf0] }
  0x24   :  { %547 = vmatpush.bf16.msra.mxu3 %v1281_v38  ;;  %v1549_v55 = vld [vmem:[#allocation5 + $0x1b4] sm:$0xf0]  ;;  %v1201_v58 = vor.u32 %v1533_v53, %v1200_v52  ;;  %v1128_v61 = vld [vmem:[#allocation5 + $0xa0] sm:$0xf]  ;;  %v1515_v63 = vld [vmem:[#allocation5 + $0xa4] sm:$0xf0]  ;;  %v1065_v4 = vor.u32 %v1499_v60, %v1064_v59 }
  0x25   :  { %509 = vmatpush.bf16.msra.mxu0 %v1081_v44  ;;  %v1265_v62 = vor.u32 %v1549_v55, %v1264_v54  ;;  %v1192_v0 = vld [vmem:[#allocation5 + $0x120] sm:$0xf]  ;;  %v1531_v1 = vld [vmem:[#allocation5 + $0x124] sm:$0xf0]  ;;  %v1129_v5 = vor.u32 %v1515_v63, %v1128_v61  ;;  %v1056_v7 = vld [vmem:[#allocation5 + $0x10] sm:$0xf] }
  0x26   :  { %522 = vmatpush.bf16.msra.mxu1 %v1145_v45  ;;  %v1256_v2 = vld [vmem:[#allocation5 + $0x1a0] sm:$0xf]  ;;  %v1547_v3 = vld [vmem:[#allocation5 + $0x1a4] sm:$0xf0]  ;;  %v1193_v6 = vor.u32 %v1531_v1, %v1192_v0  ;;  %v1497_v8 = vld [vmem:[#allocation5 + $0x14] sm:$0xf0] }
  0x27   :  { %535 = vmatpush.bf16.msra.mxu2 %v1209_v46  ;;  %v1120_v9 = vld [vmem:[#allocation5 + $0x90] sm:$0xf]  ;;  %v1257_v10 = vor.u32 %v1547_v3, %v1256_v2  ;;  %v1513_v11 = vld [vmem:[#allocation5 + $0x94] sm:$0xf0]  ;;  %v1048_v16 = vld [vmem:[#allocation5] sm:$0xf]  ;;  %v1057_v17 = vor.u32 %v1497_v8, %v1056_v7 }
  0x28   :  { %548 = vmatpush.bf16.msra.mxu3 %v1273_v50  ;;  %v1184_v12 = vld [vmem:[#allocation5 + $0x110] sm:$0xf]  ;;  %v1529_v13 = vld [vmem:[#allocation5 + $0x114] sm:$0xf0]  ;;  %v1495_v18 = vld [vmem:[#allocation5 + $0x4] sm:$0xf0]  ;;  %v1121_v21 = vor.u32 %v1513_v11, %v1120_v9 }
  0x29   :  { %510 = vmatpush.bf16.msra.mxu0 %v1073_v56  ;;  %v1248_v14 = vld [vmem:[#allocation5 + $0x190] sm:$0xf]  ;;  %v1545_v15 = vld [vmem:[#allocation5 + $0x194] sm:$0xf0]  ;;  %v1112_v19 = vld [vmem:[#allocation5 + $0x80] sm:$0xf]  ;;  %v1185_v22 = vor.u32 %v1529_v13, %v1184_v12  ;;  %v1049_v33 = vor.u32 %v1495_v18, %v1048_v16 }
  0x2a   :  { %523 = vmatpush.bf16.msra.mxu1 %v1137_v57  ;;  %v1511_v20 = vld [vmem:[#allocation5 + $0x84] sm:$0xf0]  ;;  %v1176_v23 = vld [vmem:[#allocation5 + $0x100] sm:$0xf]  ;;  %v1249_v26 = vor.u32 %v1545_v15, %v1248_v14  ;;  %v1508_v28 = vld [vmem:[#allocation5 + $0x74] sm:$0xf] }
  0x2b   :  { %536 = vmatpush.bf16.msra.mxu2 %v1201_v58  ;;  %v1527_v24 = vld [vmem:[#allocation5 + $0x104] sm:$0xf0]  ;;  %v1240_v25 = vld [vmem:[#allocation5 + $0x180] sm:$0xf]  ;;  %v1106_v29 = vld [vmem:[#allocation5 + $0x78] sm:$0xf0]  ;;  %v1113_v36 = vor.u32 %v1511_v20, %v1112_v19 }
  0x2c   :  { %549 = vmatpush.bf16.msra.mxu3 %v1265_v62  ;;  %v1543_v27 = vld [vmem:[#allocation5 + $0x184] sm:$0xf0]  ;;  %v1524_v30 = vld [vmem:[#allocation5 + $0xf4] sm:$0xf]  ;;  %v1170_v31 = vld [vmem:[#allocation5 + $0xf8] sm:$0xf0]  ;;  %v1177_v37 = vor.u32 %v1527_v24, %v1176_v23  ;;  %v1109_v41 = vor.u32 %v1508_v28, %v1106_v29 }
  0x2d   :  { %511 = vmatpush.bf16.msra.mxu0 %v1065_v4  ;;  %v101_v32 = vld [vmem:[#allocation2] sm:$0xff]  ;;  %v1540_v34 = vld [vmem:[#allocation5 + $0x174] sm:$0xf]  ;;  %v1241_v40 = vor.u32 %v1543_v27, %v1240_v25  ;;  %v1506_v42 = vld [vmem:[#allocation5 + $0x64] sm:$0xf]  ;;  %v1173_v43 = vor.u32 %v1524_v30, %v1170_v31  ;;  %s1034_s9 = sshll.u32 %s1866_s7, 4  ;;  %s1035_s9 = int_to_ptr.hbm [resolvable:$true] %s1034_s9 }
  0x2e   :  { %524 = vmatpush.bf16.msra.mxu1 %v1129_v5  ;;  %v1234_v35 = vld [vmem:[#allocation5 + $0x178] sm:$0xf0]  ;;  %103 = vst [vmem:[#allocation1] ss:$4 sm:$0xff] %v101_v32  ;;  %v1556_v38 = vld [vmem:[#allocation5 + $0x1f4] sm:$0xf] }
  0x2f   :  { %537 = vmatpush.bf16.msra.mxu2 %v1193_v6  ;;  %v1298_v39 = vld [vmem:[#allocation5 + $0x1f8] sm:$0xf0]  ;;  %v1237_v44 = vor.u32 %v1540_v34, %v1234_v35  ;;  %v1098_v45 = vld [vmem:[#allocation5 + $0x68] sm:$0xf0]  ;;  %v1522_v46 = vld [vmem:[#allocation5 + $0xe4] sm:$0xf] }
  0x30   :  { %550 = vmatpush.bf16.msra.mxu3 %v1257_v10  ;;  %v1162_v47 = vld [vmem:[#allocation5 + $0xe8] sm:$0xf0]  ;;  %v1301_v48 = vor.u32 %v1556_v38, %v1298_v39  ;;  %v1538_v49 = vld [vmem:[#allocation5 + $0x164] sm:$0xf]  ;;  %v1504_v53 = vld [vmem:[#allocation5 + $0x54] sm:$0xf]  ;;  %v1101_v55 = vor.u32 %v1506_v42, %v1098_v45 }
  0x31   :  { %512 = vmatpush.bf16.msra.mxu0 %v1057_v17  ;;  %v1226_v50 = vld [vmem:[#allocation5 + $0x168] sm:$0xf0]  ;;  %v1554_v51 = vld [vmem:[#allocation5 + $0x1e4] sm:$0xf]  ;;  %v1090_v54 = vld [vmem:[#allocation5 + $0x58] sm:$0xf0]  ;;  %v1165_v60 = vor.u32 %v1522_v46, %v1162_v47 }
  0x32   :  { %525 = vmatpush.bf16.msra.mxu1 %v1121_v21  ;;  %v1290_v52 = vld [vmem:[#allocation5 + $0x1e8] sm:$0xf0]  ;;  %v1520_v56 = vld [vmem:[#allocation5 + $0xd4] sm:$0xf]  ;;  %v1154_v57 = vld [vmem:[#allocation5 + $0xd8] sm:$0xf0]  ;;  %v1229_v61 = vor.u32 %v1538_v49, %v1226_v50  ;;  %v1093_v9 = vor.u32 %v1504_v53, %v1090_v54 }
  0x33   :  { %538 = vmatpush.bf16.msra.mxu2 %v1185_v22  ;;  %v1536_v58 = vld [vmem:[#allocation5 + $0x154] sm:$0xf]  ;;  %v1218_v59 = vld [vmem:[#allocation5 + $0x158] sm:$0xf0]  ;;  %v1293_v0 = vor.u32 %v1554_v51, %v1290_v52  ;;  %v1157_v10 = vor.u32 %v1520_v56, %v1154_v57  ;;  %v1502_v12 = vld [vmem:[#allocation5 + $0x44] sm:$0xf] }
  0x34   :  { %551 = vmatpush.bf16.msra.mxu3 %v1249_v26  ;;  %v1552_v5 = vld [vmem:[#allocation5 + $0x1d4] sm:$0xf]  ;;  %v1282_v6 = vld [vmem:[#allocation5 + $0x1d8] sm:$0xf0]  ;;  %v1221_v11 = vor.u32 %v1536_v58, %v1218_v59  ;;  %v1082_v13 = vld [vmem:[#allocation5 + $0x48] sm:$0xf0] }
  0x35   :  { %513 = vmatpush.bf16.msra.mxu0 %v1049_v33  ;;  %v106_v62 = vld.sshfl [vmem:[#allocation1 + $0x10] sm:$0xff pattern:$0x73625140]  ;;  %v104_v63 = vld.sshfl [vmem:[#allocation1] sm:$0xff pattern:$0x73625140]  ;;  %v1285_v15 = vor.u32 %v1552_v5, %v1282_v6  ;;  %v1085_v21 = vor.u32 %v1502_v12, %v1082_v13 }
  0x36   :  { %526 = vmatpush.bf16.msra.mxu1 %v1113_v36  ;;  %v1834_v1 = vpack.c.bf16 %v106_v62, %v106_v62  ;;  %v1836_v2 = vpack.c.bf16 %v104_v63, %v104_v63  ;;  %v107_v3 = vld.sshfl [vmem:[#allocation1 + $0x18] sm:$0xff pattern:$0x73625140]  ;;  %v105_v4 = vld.sshfl [vmem:[#allocation1 + $0x8] sm:$0xff pattern:$0x73625140] }
  0x37   :  { %539 = vmatpush.bf16.msra.mxu2 %v1177_v37  ;;  %v1838_v7 = vpack.c.bf16 %v107_v3, %v107_v3  ;;  %v1840_v8 = vpack.c.bf16 %v105_v4, %v105_v4  ;;  %v1518_v14 = vld [vmem:[#allocation5 + $0xc4] sm:$0xf]  ;;  %v1146_v16 = vld [vmem:[#allocation5 + $0xc8] sm:$0xf0]  ;;  %v1500_v24 = vld [vmem:[#allocation5 + $0x34] sm:$0xf] }
  0x38   :  { %552 = vmatpush.bf16.msra.mxu3 %v1241_v40  ;;  %514 = vmatmul.bf16.vlgmr.msra.gmra.mxu0 %v1836_v2  ;;  %v1534_v17 = vld [vmem:[#allocation5 + $0x144] sm:$0xf]  ;;  %v1210_v18 = vld [vmem:[#allocation5 + $0x148] sm:$0xf0]  ;;  %v1149_v22 = vor.u32 %v1518_v14, %v1146_v16  ;;  %v1074_v25 = vld [vmem:[#allocation5 + $0x38] sm:$0xf0] }
  0x39   :  { %558 = vmatpush.bf16.msrb.mxu0 %v1109_v41  ;;  %527 = vmatmul.bf16.vlgmr.msra.gmra.mxu1 %v1840_v8  ;;  %v1550_v19 = vld [vmem:[#allocation5 + $0x1c4] sm:$0xf]  ;;  %v1274_v20 = vld [vmem:[#allocation5 + $0x1c8] sm:$0xf0]  ;;  %v1213_v23 = vor.u32 %v1534_v17, %v1210_v18  ;;  %v1516_v26 = vld [vmem:[#allocation5 + $0xb4] sm:$0xf]  ;;  %v1077_v33 = vor.u32 %v1500_v24, %v1074_v25 }
  0x3a   :  { %571 = vmatpush.bf16.msrb.mxu1 %v1173_v43  ;;  %540 = vmatmul.bf16.vlgmr.msra.gmra.mxu2 %v1834_v1  ;;  %v1277_v27 = vor.u32 %v1550_v19, %v1274_v20  ;;  %v1138_v28 = vld [vmem:[#allocation5 + $0xb8] sm:$0xf0]  ;;  %v1532_v29 = vld [vmem:[#allocation5 + $0x134] sm:$0xf]  ;;  %v1498_v36 = vld [vmem:[#allocation5 + $0x24] sm:$0xf] }
  0x3b   :  { %584 = vmatpush.bf16.msrb.mxu2 %v1237_v44  ;;  %553 = vmatmul.bf16.vlgmr.msra.gmra.mxu3 %v1838_v7  ;;  %v1202_v30 = vld [vmem:[#allocation5 + $0x138] sm:$0xf0]  ;;  %v1548_v31 = vld [vmem:[#allocation5 + $0x1b4] sm:$0xf]  ;;  %v1141_v34 = vor.u32 %v1516_v26, %v1138_v28  ;;  %v1066_v37 = vld [vmem:[#allocation5 + $0x28] sm:$0xf0] }
  0x3c   :  { %597 = vmatpush.bf16.msrb.mxu3 %v1301_v48  ;;  %v1266_v32 = vld [vmem:[#allocation5 + $0x1b8] sm:$0xf0]  ;;  %v1205_v35 = vor.u32 %v1532_v29, %v1202_v30  ;;  %v1514_v38 = vld [vmem:[#allocation5 + $0xa4] sm:$0xf]  ;;  %v1130_v40 = vld [vmem:[#allocation5 + $0xa8] sm:$0xf0]  ;;  %v1069_v45 = vor.u32 %v1498_v36, %v1066_v37 }
  0x3d   :  { %559 = vmatpush.bf16.msrb.mxu0 %v1101_v55  ;;  %v1269_v39 = vor.u32 %v1548_v31, %v1266_v32  ;;  %v1530_v41 = vld [vmem:[#allocation5 + $0x124] sm:$0xf]  ;;  %v1194_v42 = vld [vmem:[#allocation5 + $0x128] sm:$0xf0]  ;;  %v1133_v46 = vor.u32 %v1514_v38, %v1130_v40  ;;  %v1496_v48 = vld [vmem:[#allocation5 + $0x14] sm:$0xf] }
  0x3e   :  { %572 = vmatpush.bf16.msrb.mxu1 %v1165_v60  ;;  %v1546_v43 = vld [vmem:[#allocation5 + $0x1a4] sm:$0xf]  ;;  %v1258_v44 = vld [vmem:[#allocation5 + $0x1a8] sm:$0xf0]  ;;  %v1197_v47 = vor.u32 %v1530_v41, %v1194_v42  ;;  %v1058_v49 = vld [vmem:[#allocation5 + $0x18] sm:$0xf0] }
  0x3f   :  { %585 = vmatpush.bf16.msrb.mxu2 %v1229_v61  ;;  %v1512_v50 = vld [vmem:[#allocation5 + $0x94] sm:$0xf]  ;;  %v1261_v51 = vor.u32 %v1546_v43, %v1258_v44  ;;  %v1122_v52 = vld [vmem:[#allocation5 + $0x98] sm:$0xf0]  ;;  %v1061_v57 = vor.u32 %v1496_v48, %v1058_v49  ;;  %v1494_v58 = vld [vmem:[#allocation5 + $0x4] sm:$0xf] }
  0x40   :  { %598 = vmatpush.bf16.msrb.mxu3 %v1293_v0  ;;  %v1528_v53 = vld [vmem:[#allocation5 + $0x114] sm:$0xf]  ;;  %v1186_v54 = vld [vmem:[#allocation5 + $0x118] sm:$0xf0]  ;;  %v1125_v59 = vor.u32 %v1512_v50, %v1122_v52  ;;  %v1050_v61 = vld [vmem:[#allocation5 + $0x8] sm:$0xf0] }
  0x41   :  { %560 = vmatpush.bf16.msrb.mxu0 %v1093_v9  ;;  %v1544_v55 = vld [vmem:[#allocation5 + $0x194] sm:$0xf]  ;;  %v1250_v56 = vld [vmem:[#allocation5 + $0x198] sm:$0xf0]  ;;  %v1189_v60 = vor.u32 %v1528_v53, %v1186_v54  ;;  %v1510_v62 = vld [vmem:[#allocation5 + $0x84] sm:$0xf] }
  0x42   :  { %573 = vmatpush.bf16.msrb.mxu1 %v1157_v10  ;;  %v1114_v63 = vld [vmem:[#allocation5 + $0x88] sm:$0xf0]  ;;  %v1253_v0 = vor.u32 %v1544_v55, %v1250_v56  ;;  %v1526_v3 = vld [vmem:[#allocation5 + $0x104] sm:$0xf]  ;;  %v1360_v9 = vld [vmem:[#allocation8 + $0x70] sm:$0xf] }
  0x43   :  { %586 = vmatpush.bf16.msrb.mxu2 %v1221_v11  ;;  %v1178_v4 = vld [vmem:[#allocation5 + $0x108] sm:$0xf0]  ;;  %v1542_v5 = vld [vmem:[#allocation5 + $0x184] sm:$0xf]  ;;  %v1573_v10 = vld [vmem:[#allocation8 + $0x74] sm:$0xf0]  ;;  %v1053_v11 = vor.u32 %v1494_v58, %v1050_v61  ;;  %v1117_v14 = vor.u32 %v1510_v62, %v1114_v63 }
  0x44   :  { %599 = vmatpush.bf16.msrb.mxu3 %v1285_v15  ;;  %v1242_v6 = vld [vmem:[#allocation5 + $0x188] sm:$0xf0]  ;;  %v1572_v12 = vld [vmem:[#allocation8 + $0x74] sm:$0xf]  ;;  %v1362_v13 = vld [vmem:[#allocation8 + $0x78] sm:$0xf0]  ;;  %v1181_v15 = vor.u32 %v1526_v3, %v1178_v4  ;;  %v1361_v17 = vor.u32 %v1573_v10, %v1360_v9 }
  0x45   :  { %561 = vmatpush.bf16.msrb.mxu0 %v1085_v21  ;;  %v1245_v16 = vor.u32 %v1542_v5, %v1242_v6  ;;  %v1365_v18 = vor.u32 %v1572_v12, %v1362_v13  ;;  %v1352_v19 = vld [vmem:[#allocation8 + $0x60] sm:$0xf]  ;;  %v1571_v20 = vld [vmem:[#allocation8 + $0x64] sm:$0xf0]  ;;  %v1570_v21 = vld [vmem:[#allocation8 + $0x64] sm:$0xf] }
  0x46   :  { %574 = vmatpush.bf16.msrb.mxu1 %v1149_v22  ;;  %v1354_v22 = vld [vmem:[#allocation8 + $0x68] sm:$0xf0]  ;;  %v1344_v25 = vld [vmem:[#allocation8 + $0x50] sm:$0xf]  ;;  %v1569_v26 = vld [vmem:[#allocation8 + $0x54] sm:$0xf0] }
  0x47   :  { %587 = vmatpush.bf16.msrb.mxu2 %v1213_v23  ;;  %v1353_v23 = vor.u32 %v1571_v20, %v1352_v19  ;;  %v1357_v24 = vor.u32 %v1570_v21, %v1354_v22  ;;  %v1346_v28 = vld [vmem:[#allocation8 + $0x58] sm:$0xf0]  ;;  %v1345_v29 = vor.u32 %v1569_v26, %v1344_v25  ;;  %v1336_v31 = vld [vmem:[#allocation8 + $0x40] sm:$0xf]  ;;  %v1567_v32 = vld [vmem:[#allocation8 + $0x44] sm:$0xf0] }
  0x48   :  { %600 = vmatpush.bf16.msrb.mxu3 %v1277_v27  ;;  %v1568_v27 = vld [vmem:[#allocation8 + $0x54] sm:$0xf]  ;;  %v1328_v36 = vld [vmem:[#allocation8 + $0x30] sm:$0xf]  ;;  %v1563_v40 = vld [vmem:[#allocation8 + $0x24] sm:$0xf0] }
  0x49   :  { %562 = vmatpush.bf16.msrb.mxu0 %v1077_v33  ;;  %v1349_v30 = vor.u32 %v1568_v27, %v1346_v28  ;;  %v1566_v33 = vld [vmem:[#allocation8 + $0x44] sm:$0xf]  ;;  %v1564_v37 = vld [vmem:[#allocation8 + $0x34] sm:$0xf]  ;;  %v1322_v43 = vld [vmem:[#allocation8 + $0x28] sm:$0xf0] }
  0x4a   :  { %575 = vmatpush.bf16.msrb.mxu1 %v1141_v34  ;;  %v1337_v34 = vor.u32 %v1567_v32, %v1336_v31  ;;  %v1562_v41 = vld [vmem:[#allocation8 + $0x24] sm:$0xf]  ;;  %v1589_v49 = vld [vmem:[#allocation8 + $0xf4] sm:$0xf0]  ;;  %v1560_v50 = vld [vmem:[#allocation8 + $0x14] sm:$0xf] }
  0x4b   :  { %588 = vmatpush.bf16.msrb.mxu2 %v1205_v35  ;;  %v1325_v44 = vor.u32 %v1562_v41, %v1322_v43  ;;  %v1588_v54 = vld [vmem:[#allocation8 + $0xf4] sm:$0xf]  ;;  %v1426_v55 = vld [vmem:[#allocation8 + $0xf8] sm:$0xf0]  ;;  %v1559_v58 = vld [vmem:[#allocation8 + $0x4] sm:$0xf0] }
  0x4c   :  { %601 = vmatpush.bf16.msrb.mxu3 %v1269_v39  ;;  %v1320_v39 = vld [vmem:[#allocation8 + $0x20] sm:$0xf]  ;;  %v1429_v56 = vor.u32 %v1588_v54, %v1426_v55  ;;  %v1587_v61 = vld [vmem:[#allocation8 + $0xe4] sm:$0xf0]  ;;  %v1558_v62 = vld [vmem:[#allocation8 + $0x4] sm:$0xf] }
  0x4d   :  { %563 = vmatpush.bf16.msrb.mxu0 %v1069_v45  ;;  %v1321_v42 = vor.u32 %v1563_v40, %v1320_v39  ;;  %v1312_v45 = vld [vmem:[#allocation8 + $0x10] sm:$0xf]  ;;  %v1306_v63 = vld [vmem:[#allocation8 + $0x8] sm:$0xf0]  ;;  %v1586_v4 = vld [vmem:[#allocation8 + $0xe4] sm:$0xf] }
  0x4e   :  { %576 = vmatpush.bf16.msrb.mxu1 %v1133_v46  ;;  %v1561_v46 = vld [vmem:[#allocation8 + $0x14] sm:$0xf0]  ;;  %v1309_v3 = vor.u32 %v1558_v62, %v1306_v63  ;;  %v1418_v5 = vld [vmem:[#allocation8 + $0xe8] sm:$0xf0]  ;;  %v1408_v9 = vld [vmem:[#allocation8 + $0xd0] sm:$0xf] }
  0x4f   :  { %589 = vmatpush.bf16.msrb.mxu2 %v1197_v47  ;;  %v1424_v47 = vld [vmem:[#allocation8 + $0xf0] sm:$0xf]  ;;  %v1313_v48 = vor.u32 %v1561_v46, %v1312_v45  ;;  %v1421_v6 = vor.u32 %v1586_v4, %v1418_v5  ;;  %v1585_v10 = vld [vmem:[#allocation8 + $0xd4] sm:$0xf0]  ;;  %v1410_v13 = vld [vmem:[#allocation8 + $0xd8] sm:$0xf0] }
  0x50   :  { %602 = vmatpush.bf16.msrb.mxu3 %v1261_v51  ;;  %v1314_v51 = vld [vmem:[#allocation8 + $0x18] sm:$0xf0]  ;;  %v1425_v52 = vor.u32 %v1589_v49, %v1424_v47  ;;  %v1409_v12 = vor.u32 %v1585_v10, %v1408_v9  ;;  %v1392_v21 = vld [vmem:[#allocation8 + $0xb0] sm:$0xf]  ;;  %v1581_v22 = vld [vmem:[#allocation8 + $0xb4] sm:$0xf0] }
  0x51   :  { %564 = vmatpush.bf16.msrb.mxu0 %v1061_v57  ;;  %v1317_v53 = vor.u32 %v1560_v50, %v1314_v51  ;;  %v1304_v57 = vld [vmem:[#allocation8] sm:$0xf]  ;;  %v1394_v25 = vld [vmem:[#allocation8 + $0xb8] sm:$0xf0]  ;;  %v1575_v43 = vld [vmem:[#allocation8 + $0x84] sm:$0xf0] }
  0x52   :  { %577 = vmatpush.bf16.msrb.mxu1 %v1125_v59  ;;  %v1416_v59 = vld [vmem:[#allocation8 + $0xe0] sm:$0xf]  ;;  %v180_v26 = vld [vmem:[#allocation7] sm:$0x3]  ;;  %v1370_v47 = vld [vmem:[#allocation8 + $0x88] sm:$0xf0] }
  0x53   :  { %590 = vmatpush.bf16.msrb.mxu2 %v1189_v60  ;;  %v1305_v60 = vor.u32 %v1559_v58, %v1304_v57  ;;  %v1384_v28 = vld [vmem:[#allocation8 + $0xa0] sm:$0xf]  ;;  %v182_v31 = vperm.slane %v180_v26, 0  ;;  %v183_v57 = vperm.slane %v180_v26, 1 }
  0x54   :  { %603 = vmatpush.bf16.msrb.mxu3 %v1253_v0  ;;  %v1417_v0 = vor.u32 %v1587_v61, %v1416_v59 }
  0x55   :  { %565 = vmatpush.bf16.msrb.mxu0 %v1053_v11  ;;  %v1584_v11 = vld [vmem:[#allocation8 + $0xd4] sm:$0xf] }
  0x56   :  { %578 = vmatpush.bf16.msrb.mxu1 %v1117_v14  ;;  %v1413_v14 = vor.u32 %v1584_v11, %v1410_v13  ;;  %v1596_v13 = vld [vmem:[#allocation10 + $0x30] sm:$0xff] }
  0x57   :  { %591 = vmatpush.bf16.msrb.mxu2 %v1181_v15  ;;  %v1400_v15 = vld [vmem:[#allocation8 + $0xc0] sm:$0xf] }
  0x58   :  { %604 = vmatpush.bf16.msrb.mxu3 %v1245_v16  ;;  %566 = vmatmul.bf16.vlgmr.msrb.gmra.mxu0 %v1836_v2  ;;  %v1338_v2 = vld [vmem:[#allocation8 + $0x48] sm:$0xf0]  ;;  %v1583_v16 = vld [vmem:[#allocation8 + $0xc4] sm:$0xf0] }
  0x59   :  { %812 = vmatpush.bf16.msra.mxu0 %v1361_v17  ;;  %579 = vmatmul.bf16.vlgmr.msrb.gmra.mxu1 %v1840_v8  ;;  %v1341_v35 = vor.u32 %v1566_v33, %v1338_v2  ;;  %v1565_v8 = vld [vmem:[#allocation8 + $0x34] sm:$0xf0]  ;;  %v1582_v17 = vld [vmem:[#allocation8 + $0xc4] sm:$0xf]  ;;  %v1401_v19 = vor.u32 %v1583_v16, %v1400_v15  ;;  %v1386_v33 = vld [vmem:[#allocation8 + $0xa8] sm:$0xf0] }
  0x5a   :  { %592 = vmatmul.bf16.vlgmr.msrb.gmra.mxu2 %v1834_v1  ;;  %v1330_v1 = vld [vmem:[#allocation8 + $0x38] sm:$0xf0]  ;;  %v1329_v38 = vor.u32 %v1565_v8, %v1328_v36  ;;  %825 = vmatpush.bf16.msra.mxu1 %v1425_v52  ;;  %v1577_v36 = vld [vmem:[#allocation8 + $0x94] sm:$0xf0]  ;;  %v1576_v8 = vld [vmem:[#allocation8 + $0x94] sm:$0xf] }
  0x5b   :  { %838 = vmatpush.bf16.msra.mxu2 %v1365_v18  ;;  %605 = vmatmul.bf16.vlgmr.msrb.gmra.mxu3 %v1838_v7  ;;  %v1333_v7 = vor.u32 %v1564_v37, %v1330_v1  ;;  %v1402_v18 = vld [vmem:[#allocation8 + $0xc8] sm:$0xf0]  ;;  %v1604_v16 = vld [vmem:[#allocation10 + $0x70] sm:$0xff] }
  0x5c   :  { %851 = vmatpush.bf16.msra.mxu3 %v1429_v56  ;;  %v1405_v20 = vor.u32 %v1582_v17, %v1402_v18  ;;  %v1595_v15 = vld [vmem:[#allocation10 + $0x28] sm:$0xff]  ;;  %v1594_v17 = vld [vmem:[#allocation10 + $0x20] sm:$0xff] }
  0x5d   :  { %813 = vmatpush.bf16.msra.mxu0 %v1353_v23  ;;  %v1580_v23 = vld [vmem:[#allocation8 + $0xb4] sm:$0xf]  ;;  %v1603_v18 = vld [vmem:[#allocation10 + $0x68] sm:$0xff] }
  0x5e   :  { %826 = vmatpush.bf16.msra.mxu1 %v1417_v0  ;;  %v1397_v27 = vor.u32 %v1580_v23, %v1394_v25  ;;  %v1591_v23 = vld [vmem:[#allocation10 + $0x8] sm:$0xff]  ;;  %v1590_v25 = vld [vmem:[#allocation10] sm:$0xff] }
  0x5f   :  { %839 = vmatpush.bf16.msra.mxu2 %v1357_v24  ;;  %v1393_v24 = vor.u32 %v1581_v22, %v1392_v21  ;;  %v1592_v21 = vld [vmem:[#allocation10 + $0x10] sm:$0xff]  ;;  %v1601_v22 = vld [vmem:[#allocation10 + $0x58] sm:$0xff] }
  0x60   :  { %852 = vmatpush.bf16.msra.mxu3 %v1421_v6 }
  0x61   :  { %814 = vmatpush.bf16.msra.mxu0 %v1345_v29  ;;  %v1579_v29 = vld [vmem:[#allocation8 + $0xa4] sm:$0xf0] }
  0x62   :  { %827 = vmatpush.bf16.msra.mxu1 %v1409_v12  ;;  %v1385_v32 = vor.u32 %v1579_v29, %v1384_v28  ;;  %v1597_v12 = vld [vmem:[#allocation10 + $0x38] sm:$0xff]  ;;  %v1598_v28 = vld [vmem:[#allocation10 + $0x40] sm:$0xff] }
  0x63   :  { %840 = vmatpush.bf16.msra.mxu2 %v1349_v30  ;;  %v1578_v30 = vld [vmem:[#allocation8 + $0xa4] sm:$0xf] }
  0x64   :  { %853 = vmatpush.bf16.msra.mxu3 %v1413_v14  ;;  %v1389_v2 = vor.u32 %v1578_v30, %v1386_v33  ;;  %v1605_v14 = vld [vmem:[#allocation10 + $0x78] sm:$0xff] }
  0x65   :  { %815 = vmatpush.bf16.msra.mxu0 %v1337_v34 }
  0x66   :  { %828 = vmatpush.bf16.msra.mxu1 %v1401_v19  ;;  %v1593_v19 = vld [vmem:[#allocation10 + $0x18] sm:$0xff] }
  0x67   :  { %841 = vmatpush.bf16.msra.mxu2 %v1341_v35  ;;  %v1376_v35 = vld [vmem:[#allocation8 + $0x90] sm:$0xf] }
  0x68   :  { %854 = vmatpush.bf16.msra.mxu3 %v1405_v20  ;;  %v1602_v20 = vld [vmem:[#allocation10 + $0x60] sm:$0xff] }
  0x69   :  { %816 = vmatpush.bf16.msra.mxu0 %v1329_v38  ;;  %v1377_v38 = vor.u32 %v1577_v36, %v1376_v35 }
  0x6a   :  { %829 = vmatpush.bf16.msra.mxu1 %v1393_v24  ;;  %v1600_v24 = vld [vmem:[#allocation10 + $0x50] sm:$0xff] }
  0x6b   :  { %842 = vmatpush.bf16.msra.mxu2 %v1333_v7  ;;  %v1378_v7 = vld [vmem:[#allocation8 + $0x98] sm:$0xf0] }
  0x6c   :  { %855 = vmatpush.bf16.msra.mxu3 %v1397_v27  ;;  %v1381_v39 = vor.u32 %v1576_v8, %v1378_v7  ;;  %v1599_v27 = vld [vmem:[#allocation10 + $0x48] sm:$0xff] }
  0x6d   :  { %817 = vmatpush.bf16.msra.mxu0 %v1321_v42  ;;  %v1368_v42 = vld [vmem:[#allocation8 + $0x80] sm:$0xf] }
  0x6e   :  { %830 = vmatpush.bf16.msra.mxu1 %v1385_v32  ;;  %v1369_v46 = vor.u32 %v1575_v43, %v1368_v42  ;;  %v646_v32 = vld [vmem:[%s1863_s4] sm:$0x3]  ;;  %s1778_s4 = smov [#allocation11]  }
  0x6f   :  { %843 = vmatpush.bf16.msra.mxu2 %v1325_v44  ;;  %v1574_v44 = vld [vmem:[#allocation8 + $0x84] sm:$0xf]  ;;  %v648_v33 = vperm.slane %v646_v32, 0  ;;  %v649_v35 = vperm.slane %v646_v32, 1  ;;  %s1032_s29 = sshll.u32 %s1778_s4, 4  ;;  %s1033_s29 = int_to_ptr.vmem [resolvable:$true] %s1032_s29 }
  0x70   :  { %856 = vmatpush.bf16.msra.mxu3 %v1389_v2 }
  0x71   :  { %818 = vmatpush.bf16.msra.mxu0 %v1313_v48  ;;  %v1373_v48 = vor.u32 %v1574_v44, %v1370_v47  ;;  %v1616_v44 = vld [vmem:[%s1865_s6] ss:$0 sm:$0xff] }
  0x72   :  { %831 = vmatpush.bf16.msra.mxu1 %v1377_v38 }
  0x73   :  { %844 = vmatpush.bf16.msra.mxu2 %v1317_v53 }
  0x74   :  { %857 = vmatpush.bf16.msra.mxu3 %v1381_v39 }
  0x75   :  { %819 = vmatpush.bf16.msra.mxu0 %v1305_v60 }
  0x76   :  { %832 = vmatpush.bf16.msra.mxu1 %v1369_v46 }
  0x77   :  { %845 = vmatpush.bf16.msra.mxu2 %v1309_v3 }
  0x78   :  { %858 = vmatpush.bf16.msra.mxu3 %v1373_v48 }
  0x79   :  { %1000 = vmatpush.bf16.msrb.mxu0 %v1597_v12 }
  0x7a   :  { %1013 = vmatpush.bf16.msrb.mxu1 %v1605_v14 }
  0x7d   :  { %1001 = vmatpush.bf16.msrb.mxu0 %v1596_v13 }
  0x7e   :  { %1014 = vmatpush.bf16.msrb.mxu1 %v1604_v16 }
  0x81   :  { %1002 = vmatpush.bf16.msrb.mxu0 %v1595_v15 }
  0x82   :  { %1015 = vmatpush.bf16.msrb.mxu1 %v1603_v18 }
  0x85   :  { %1003 = vmatpush.bf16.msrb.mxu0 %v1594_v17 }
  0x86   :  { %1016 = vmatpush.bf16.msrb.mxu1 %v1602_v20 }
  0x89   :  { %1004 = vmatpush.bf16.msrb.mxu0 %v1593_v19 }
  0x8a   :  { %1017 = vmatpush.bf16.msrb.mxu1 %v1601_v22 }
  0x8d   :  { %1005 = vmatpush.bf16.msrb.mxu0 %v1592_v21 }
  0x8e   :  { %1018 = vmatpush.bf16.msrb.mxu1 %v1600_v24 }
  0x91   :  { %1006 = vmatpush.bf16.msrb.mxu0 %v1591_v23 }
  0x92   :  { %1019 = vmatpush.bf16.msrb.mxu1 %v1599_v27 }
  0x95   :  { %1007 = vmatpush.bf16.msrb.mxu0 %v1590_v25 }
  0x96   :  { %1020 = vmatpush.bf16.msrb.mxu1 %v1598_v28 }
  0xb5   :  { %v515_v34 = vpop.f32.mrf.mxu0 }
  0xb6   :  { %v516_v37 = vadd.f32 %v515_v34, %v182_v31  ;;  %v528_v1 = vpop.f32.mrf.mxu1 }
  0xb8   :  { %v529_v40 = vadd.f32 %v528_v1, %v516_v37 }
  0xbd   :  { %v541_v41 = vpop.f32.mrf.mxu2  ;;  %v517_v51 = vpop.f32.mrf.mxu0 }
  0xbe   :  { %v542_v45 = vadd.f32 %v541_v41, %v529_v40  ;;  %v554_v49 = vpop.f32.mrf.mxu3  ;;  %v530_v52 = vpop.f32.mrf.mxu1 }
  0xc0   :  { %v555_v50 = vadd.f32 %v554_v49, %v542_v45 }
  0xc2   :  { %v610_v53 = vmax.f32 %v555_v50, 0.0 }
  0xc4   :  { %v612_v54 = vpack.c.bf16 %v610_v53, %v610_v53 }
  0xc5   :  { %v543_v55 = vpop.f32.mrf.mxu2 }
  0xc6   :  { %820 = vmatmul.bf16.vlgmr.msra.gmra.mxu0 %v612_v54  ;;  %846 = vmatmul.bf16.vlgmr.msra.gmra.mxu2 %v612_v54  ;;  %v556_v56 = vpop.f32.mrf.mxu3 }
  0xd5   :  { %v567_v58 = vpop.f32.mrf.mxu0 }
  0xd6   :  { %v568_v59 = vadd.f32 %v567_v58, %v183_v57  ;;  %v580_v60 = vpop.f32.mrf.mxu1 }
  0xd8   :  { %v581_v61 = vadd.f32 %v580_v60, %v568_v59 }
  0xdd   :  { %v593_v62 = vpop.f32.mrf.mxu2  ;;  %v569_v3 = vpop.f32.mrf.mxu0 }
  0xde   :  { %v594_v63 = vadd.f32 %v593_v62, %v581_v61  ;;  %v606_v0 = vpop.f32.mrf.mxu3  ;;  %v582_v4 = vpop.f32.mrf.mxu1 }
  0xe0   :  { %v607_v5 = vadd.f32 %v606_v0, %v594_v63 }
  0xe2   :  { %v611_v6 = vmax.f32 %v607_v5, 0.0 }
  0xe4   :  { %v613_v9 = vpack.c.bf16 %v611_v6, %v611_v6 }
  0xe5   :  { %v595_v10 = vpop.f32.mrf.mxu2 }
  0xe6   :  { %v608_v11 = vpop.f32.mrf.mxu3  ;;  %833 = vmatmul.bf16.vlgmr.msra.gmra.mxu1 %v613_v9  ;;  %859 = vmatmul.bf16.vlgmr.msra.gmra.mxu3 %v613_v9 }
 0x143   :  { %v821_v26 = vpop.f32.mrf.mxu0 }
 0x144   :  { %v822_v2 = vadd.f32 %v821_v26, %v648_v33 }
 0x149   :  { %v847_v29 = vpop.f32.mrf.mxu2 }
 0x14a   :  { %v848_v37 = vadd.f32 %v847_v29, %v649_v35 }
 0x14b   :  { %v823_v30 = vpop.f32.mrf.mxu0 }
 0x151   :  { %v849_v31 = vpop.f32.mrf.mxu2 }
 0x163   :  { %v834_v34 = vpop.f32.mrf.mxu1 }
 0x164   :  { %v835_v36 = vadd.f32 %v834_v34, %v822_v2 }
 0x166   :  { %v864_v8 = vmax.f32 %v835_v36, 0.0 }
 0x168   :  { %v866_v1 = vpack.c.bf16 %v864_v8, %v864_v8 }
 0x169   :  { %v860_v38 = vpop.f32.mrf.mxu3 }
 0x16a   :  { %v861_v7 = vadd.f32 %v860_v38, %v848_v37  ;;  %1008 = vmatmul.bf16.vlgmr.msrb.gmra.mxu0 %v866_v1 }
 0x16b   :  { %v836_v39 = vpop.f32.mrf.mxu1 }
 0x16c   :  { %v865_v40 = vmax.f32 %v861_v7, 0.0 }
 0x16e   :  { %v867_v41 = vpack.c.bf16 %v865_v40, %v865_v40 }
 0x170   :  { %1021 = vmatmul.bf16.vlgmr.msrb.gmra.mxu1 %v867_v41 }
 0x171   :  { %v862_v42 = vpop.f32.mrf.mxu3 }
 0x1e7   :  { %v1009_v43 = vpop.f32.mrf.mxu0 }
 0x1e8   :  { %v1010_v45 = vadd.f32 %v1616_v44, %v1009_v43 }
 0x1ed   :  { %v1022_v46 = vpop.f32.mrf.mxu1 }
 0x1ee   :  { %v1023_v47 = vadd.f32 %v1022_v46, %v1010_v45 }
 0x1ef   :  { %v1011_v48 = vpop.f32.mrf.mxu0 }
 0x1f0   :  { %1026 = vst [vmem:[#allocation11] sm:$0x3] %v1023_v47 }
 0x1f1   :  { %1037 = dma.vmem_to_hbm [thread:$0]  %s1033_s29, 32, %s1035_s9, [#allocation4]  }
 0x1f5   :  { %v1024_v49 = vpop.f32.mrf.mxu1 }
 0x1f6   :  { %1767 = dma.done.wait [#allocation4], 32  }
 0x1f7   :  { %1768 = vsyncadd [#allocation4], 4294967264 }
 0x1f8   :  { %1042 = vsyncpa [#allocation3], 1 }
 0x1f9   :  { %1043 = vsyncpa [#allocation6], 1 }
 0x1fa   :  { %1044 = vsyncpa [#allocation9], 1 }
 0x1fb   :  { %1045 = vsyncpa [#allocation4], 1 }

</bundles_post_ra>
